<compile_context>
chip_gen: v7x
topology: tpu7x:2x2x1
jax: 0.10.0
libtpu: 0.0.40
codegen_flags: <defaults>
</compile_context>

<pallas_src>
import functools

import jax
import jax.numpy as jnp
from jax import lax
from jax.experimental import pallas as pl
from jax.experimental.pallas import tpu as pltpu

_LANE = 128
_GATHER_UNROLL = 8          # rows per fori_loop step (partial unroll)
_NEG_FILL = -1e30           # finite fill for padded vocab columns


def _round_up(x, m):
    return (x + m - 1) // m * m


def _auto_tile(n):
    """Largest row tile (multiple of 8, <=1024); prefer one dividing n."""
    candidates = (1024, 512, 256, 128, 64, 32, 16, 8)
    for t in candidates:
        if n >= t and n % t == 0:
            return t
    for t in candidates:
        if n >= t:
            return t
    return 8


def _make_kernel(*, tile_n, n_rows, vp, has_targets):
    """Fused row-gather (+ optional cross-entropy) kernel body."""
    unroll = min(_GATHER_UNROLL, tile_n)
    n_blocks = tile_n // unroll          # tile_n is a multiple of 8
    full_unroll = n_blocks <= 4

    def gather_rows(toks_sref, table_ref, logits_ref, base):
        # Serial per-row gather from the VMEM-resident table, partially
        # unrolled (no loop-carried FP state) so loads/stores pipeline.
        def block_body(blk, carry):
            j0 = pl.multiple_of(blk * unroll, unroll)
            for u in range(unroll):
                j = j0 + u
                tok = toks_sref[base + j]                      # SMEM scalar read
                logits_ref[pl.ds(j, 1), :] = table_ref[pl.ds(tok, 1), :]
            return carry
        lax.fori_loop(0, n_blocks, block_body, 0, unroll=full_unroll)

    if not has_targets:
        def kernel(toks_sref, table_ref, logits_ref):
            base = pl.program_id(0) * tile_n
            gather_rows(toks_sref, table_ref, logits_ref, base)
        return kernel

    def kernel(toks_sref, tgts_ref, table_ref, logits_ref, nll_ref):
        base = pl.program_id(0) * tile_n
        gather_rows(toks_sref, table_ref, logits_ref, base)

        # Vectorized fused cross-entropy over the tile just written.
        logits = logits_ref[...]                               # (tile_n, vp)
        m = jnp.max(logits, axis=-1, keepdims=True)
        lse = m + jnp.log(jnp.sum(jnp.exp(logits - m),
                                  axis=-1, keepdims=True))     # (tile_n, 1)
        col = lax.broadcasted_iota(jnp.int32, (tile_n, vp), 1)
        tgt = tgts_ref[...]                                    # (tile_n, 1)
        tgt_logit = jnp.sum(jnp.where(col == tgt, logits, 0.0),
                            axis=-1, keepdims=True)            # (tile_n, 1)
        row_idx = base + lax.broadcasted_iota(jnp.int32, (tile_n, 1), 0)
        valid = row_idx < n_rows                               # mask pad rows
        nll_ref[...] = jnp.where(valid, lse - tgt_logit, 0.0)

    return kernel


@functools.partial(jax.jit, static_argnames=("tile_n", "has_targets"))
def _bigram_pallas(toks, tgts, table, *, tile_n, has_targets):
    n_rows = toks.shape[0]
    v, vp = table.shape                       # vp is already lane-padded
    n_pad = _round_up(n_rows, tile_n)
    pad = n_pad - n_rows
    if pad:
        toks = jnp.pad(toks, (0, pad))        # pad token 0 is always in range
        if has_targets:
            tgts = jnp.pad(tgts, (0, pad))

    grid = (n_pad // tile_n,)
    kernel = _make_kernel(tile_n=tile_n, n_rows=n_rows, vp=vp,
                          has_targets=has_targets)

    # VMEM budget: resident table (double-buffered by the pipeliner) +
    # double-buffered logits / target / nll tiles + headroom.
    vmem_need = (2 * v * vp + 2 * tile_n * vp + 4 * tile_n) * 4 + (2 << 20)
    vmem_limit = int(min(max(vmem_need, 16 << 20), 100 << 20))
    compiler_params = pltpu.CompilerParams(
        dimension_semantics=("parallel",),    # independent row tiles (megacore)
        vmem_limit_bytes=vmem_limit)

    if has_targets:
        tgts2d = tgts.reshape(n_pad, 1)
        grid_spec = pltpu.PrefetchScalarGridSpec(
            num_scalar_prefetch=1,            # token ids -> SMEM
            grid=grid,
            in_specs=[
                pl.BlockSpec((tile_n, 1), lambda i, toks_s: (i, 0)),   # targets
                pl.BlockSpec((v, vp), lambda i, toks_s: (0, 0)),       # table
            ],
            out_specs=(
                pl.BlockSpec((tile_n, vp), lambda i, toks_s: (i, 0)),  # logits
                pl.BlockSpec((tile_n, 1), lambda i, toks_s: (i, 0)),   # nll
            ),
        )
        out_shape = (jax.ShapeDtypeStruct((n_pad, vp), jnp.float32),
                     jax.ShapeDtypeStruct((n_pad, 1), jnp.float32))
        logits_pad, nll = pl.pallas_call(
            kernel, grid_spec=grid_spec, out_shape=out_shape,
            compiler_params=compiler_params,
        )(toks, tgts2d, table)
        # Padded rows were written as exactly 0 in-kernel.
        loss = jnp.sum(nll) * jnp.float32(1.0 / n_rows)
        return logits_pad, loss

    grid_spec = pltpu.PrefetchScalarGridSpec(
        num_scalar_prefetch=1,
        grid=grid,
        in_specs=[pl.BlockSpec((v, vp), lambda i, toks_s: (0, 0))],
        out_specs=pl.BlockSpec((tile_n, vp), lambda i, toks_s: (i, 0)),
    )
    out_shape = jax.ShapeDtypeStruct((n_pad, vp), jnp.float32)
    logits_pad = pl.pallas_call(
        kernel, grid_spec=grid_spec, out_shape=out_shape,
        compiler_params=compiler_params,
    )(toks, table)
    return logits_pad, None


def bigram_forward(table, batch_toks, batch_tok_targets=None, tile_n=None):
    """Functional forward matching the PyTorch module semantics."""
    B, T = batch_toks.shape
    N = B * T
    V = table.shape[0]
    if tile_n is None:
        tile_n = _auto_tile(N)
    tile_n = max(8, _round_up(int(tile_n), 8))

    # Lane-dense vocab: pad columns to a multiple of 128 with a large negative
    # (exp(pad - m) == 0 in the LSE; targets are always < V so never matched).
    Vp = _round_up(V, _LANE)
    table_p = table if Vp == V else jnp.pad(
        table, ((0, 0), (0, Vp - V)), constant_values=_NEG_FILL)

    toks_flat = batch_toks.reshape(N).astype(jnp.int32)

    if batch_tok_targets is None:
        logits_pad, _ = _bigram_pallas(toks_flat, None, table_p,
                                       tile_n=tile_n, has_targets=False)
        logits = logits_pad if logits_pad.shape == (N, V) else logits_pad[:N, :V]
        # PyTorch returns (B, T, C) logits and None loss on this path.
        return logits.reshape(B, T, V), None

    tgts_flat = batch_tok_targets.reshape(N).astype(jnp.int32)
    logits_pad, loss = _bigram_pallas(toks_flat, tgts_flat, table_p,
                                      tile_n=tile_n, has_targets=True)
    logits = logits_pad if logits_pad.shape == (N, V) else logits_pad[:N, :V]
    # PyTorch returns the viewed (B*T, C) logits and a scalar mean loss.
    return logits, loss


class BigramLanguageModel:
    """JAX/Pallas port of the PyTorch BigramLanguageModel (forward only)."""

    def __init__(self, vocab_size, key):
        self.vocab_size = vocab_size
        # nn.Embedding default init: N(0, 1)
        self.logit_table = jax.random.normal(
            key, (vocab_size, vocab_size), dtype=jnp.float32)

    def __call__(self, batch_toks, batch_tok_targets=None):
        return bigram_forward(self.logit_table, batch_toks, batch_tok_targets)

    # TODO(synk): `generate` uses torch.multinomial sampling in a Python loop;
    # it is host-side control flow, not a kernel hot path, so it is omitted.


def _reference_forward(table, batch_toks, batch_tok_targets):
    """Pure-JAX reference matching the PyTorch semantics."""
    logits = table[batch_toks]                       # (B, T, V)
    B, T, V = logits.shape
    logits = logits.reshape(B * T, V)
    targets = batch_tok_targets.reshape(B * T)
    logp = jax.nn.log_softmax(logits, axis=-1)
    loss = -jnp.mean(jnp.take_along_axis(logp, targets[:, None], axis=-1))
    return logits, loss


if __name__ == "__main__":
    vocab_size = 128     # synthetic vocab (len(chars) in the original script)
    B, T = 2, 8

    key = jax.random.PRNGKey(0)
    k_table, k_toks, k_tgts = jax.random.split(key, 3)

    model = BigramLanguageModel(vocab_size, k_table)
    batch_toks = jax.random.randint(k_toks, (B, T), 0, vocab_size,
                                    dtype=jnp.int32)
    batch_tok_targets = jax.random.randint(k_tgts, (B, T), 0, vocab_size,
                                           dtype=jnp.int32)

    # --- training path ---------------------------------------------------
    logits, loss = model(batch_toks, batch_tok_targets)
    logits, loss = jax.block_until_ready((logits, loss))
    ref_logits, ref_loss = _reference_forward(model.logit_table, batch_toks,
                                              batch_tok_targets)
    assert logits.shape == (B * T, vocab_size)
    assert jnp.allclose(logits, ref_logits, atol=1e-5, rtol=1e-5)
    assert jnp.allclose(loss, ref_loss, atol=1e-5, rtol=1e-5)

    # --- inference path (no targets): (B, T, V) logits, no CE computed ----
    logits_inf, no_loss = model(batch_toks)
    logits_inf = jax.block_until_ready(logits_inf)
    assert logits_inf.shape == (B, T, vocab_size)
    assert no_loss is None
    assert jnp.allclose(logits_inf.reshape(B * T, vocab_size), ref_logits,
                        atol=1e-5, rtol=1e-5)

    # --- multi-step parallel grid: tile_n=8 -> grid=(2,) -------------------
    lg2, ls2 = bigram_forward(model.logit_table, batch_toks,
                              batch_tok_targets, tile_n=8)
    lg2, ls2 = jax.block_until_ready((lg2, ls2))
    assert jnp.allclose(lg2, ref_logits, atol=1e-5, rtol=1e-5)
    assert jnp.allclose(ls2, ref_loss, atol=1e-5, rtol=1e-5)

    # --- ragged N (row padding + masked loss): N=15 padded to 16 ----------
    b3, t5 = 3, 5
    toks3 = jax.random.randint(jax.random.PRNGKey(1), (b3, t5), 0, vocab_size,
                               dtype=jnp.int32)
    tgts3 = jax.random.randint(jax.random.PRNGKey(2), (b3, t5), 0, vocab_size,
                               dtype=jnp.int32)
    lg3, ls3 = bigram_forward(model.logit_table, toks3, tgts3)
    lg3, ls3 = jax.block_until_ready((lg3, ls3))
    ref_lg3, ref_ls3 = _reference_forward(model.logit_table, toks3, tgts3)
    assert lg3.shape == (b3 * t5, vocab_size)
    assert jnp.allclose(lg3, ref_lg3, atol=1e-5, rtol=1e-5)
    assert jnp.allclose(ls3, ref_ls3, atol=1e-5, rtol=1e-5)

    # --- real char-level vocab (V=65): lane-padded table path --------------
    v65 = 65
    table65 = jax.random.normal(jax.random.PRNGKey(3), (v65, v65),
                                dtype=jnp.float32)
    toks65 = jax.random.randint(jax.random.PRNGKey(4), (2, 7), 0, v65,
                                dtype=jnp.int32)
    tgts65 = jax.random.randint(jax.random.PRNGKey(5), (2, 7), 0, v65,
                                dtype=jnp.int32)
    lg65, ls65 = bigram_forward(table65, toks65, tgts65)
    lg65, ls65 = jax.block_until_ready((lg65, ls65))
    ref_lg65, ref_ls65 = _reference_forward(table65, toks65, tgts65)
    assert lg65.shape == (14, v65)
    assert jnp.allclose(lg65, ref_lg65, atol=1e-5, rtol=1e-5)
    assert jnp.allclose(ls65, ref_ls65, atol=1e-5, rtol=1e-5)

    print("KERNEL_OK")
</pallas_src>

<mosaic_0001>
module attributes {stable_mosaic.version = 11 : i64} {
  func.func @kernel(%arg0: i32, %arg1: memref<16xi32, #tpu.memory_space<smem>>, %arg2: memref<16x1xi32, #tpu.memory_space<vmem>>, %arg3: memref<128x128xf32, #tpu.memory_space<vmem>>, %arg4: memref<16x128xf32, #tpu.memory_space<vmem>>, %arg5: memref<16x1xf32, #tpu.memory_space<vmem>>) attributes {dimension_semantics = [#tpu.dimension_semantics<parallel>], iteration_bounds = array<i64: 1>, scalar_prefetch = 1 : i64, scratch_operands = 0 : i64, tpu.core_type = #tpu.core_type<tc>, window_params = [{transform_indices = @transform_0, window_bounds = array<i64: 16, 1>}, {pipeline_mode = #tpu.pipeline_mode<synchronous>, transform_indices = @transform_1, window_bounds = array<i64: 128, 128>}, {transform_indices = @transform_2, window_bounds = array<i64: 16, 128>}, {transform_indices = @transform_3, window_bounds = array<i64: 16, 1>}]} {
    %c16_i32 = arith.constant 16 : i32
    %0 = arith.muli %arg0, %c16_i32 : i32
    %c0_i32 = arith.constant 0 : i32
    %c8_i32 = arith.constant 8 : i32
    %1 = arith.muli %c0_i32, %c8_i32 : i32
    %2 = tpu.assume_multiple %1, 8 : i32
    %c0_i32_0 = arith.constant 0 : i32
    %3 = arith.addi %2, %c0_i32_0 : i32
    %4 = arith.addi %0, %3 : i32
    %5 = arith.index_cast %4 : i32 to index
    %6 = memref.load %arg1[%5] : memref<16xi32, #tpu.memory_space<smem>>
    %7 = arith.index_cast %6 : i32 to index
    %c0 = arith.constant 0 : index
    %8 = vector.load %arg3[%7, %c0] : memref<128x128xf32, #tpu.memory_space<vmem>>, vector<1x128xf32>
    %9 = arith.index_cast %3 : i32 to index
    %c0_1 = arith.constant 0 : index
    %10 = vector.load %arg4[%9, %c0_1] : memref<16x128xf32, #tpu.memory_space<vmem>>, vector<1x128xf32>
    tpu.vector_store %arg4[%9, %c0_1], %8 {strides = array<i32>} : memref<16x128xf32, #tpu.memory_space<vmem>>, vector<1x128xf32>,
    %c1_i32 = arith.constant 1 : i32
    %11 = arith.addi %2, %c1_i32 : i32
    %12 = arith.addi %0, %11 : i32
    %13 = arith.index_cast %12 : i32 to index
    %14 = memref.load %arg1[%13] : memref<16xi32, #tpu.memory_space<smem>>
    %15 = arith.index_cast %14 : i32 to index
    %c0_2 = arith.constant 0 : index
    %16 = vector.load %arg3[%15, %c0_2] : memref<128x128xf32, #tpu.memory_space<vmem>>, vector<1x128xf32>
    %17 = arith.index_cast %11 : i32 to index
    %c0_3 = arith.constant 0 : index
    %18 = vector.load %arg4[%17, %c0_3] : memref<16x128xf32, #tpu.memory_space<vmem>>, vector<1x128xf32>
    tpu.vector_store %arg4[%17, %c0_3], %16 {strides = array<i32>} : memref<16x128xf32, #tpu.memory_space<vmem>>, vector<1x128xf32>,
    %c2_i32 = arith.constant 2 : i32
    %19 = arith.addi %2, %c2_i32 : i32
    %20 = arith.addi %0, %19 : i32
    %21 = arith.index_cast %20 : i32 to index
    %22 = memref.load %arg1[%21] : memref<16xi32, #tpu.memory_space<smem>>
    %23 = arith.index_cast %22 : i32 to index
    %c0_4 = arith.constant 0 : index
    %24 = vector.load %arg3[%23, %c0_4] : memref<128x128xf32, #tpu.memory_space<vmem>>, vector<1x128xf32>
    %25 = arith.index_cast %19 : i32 to index
    %c0_5 = arith.constant 0 : index
    %26 = vector.load %arg4[%25, %c0_5] : memref<16x128xf32, #tpu.memory_space<vmem>>, vector<1x128xf32>
    tpu.vector_store %arg4[%25, %c0_5], %24 {strides = array<i32>} : memref<16x128xf32, #tpu.memory_space<vmem>>, vector<1x128xf32>,
    %c3_i32 = arith.constant 3 : i32
    %27 = arith.addi %2, %c3_i32 : i32
    %28 = arith.addi %0, %27 : i32
    %29 = arith.index_cast %28 : i32 to index
    %30 = memref.load %arg1[%29] : memref<16xi32, #tpu.memory_space<smem>>
    %31 = arith.index_cast %30 : i32 to index
    %c0_6 = arith.constant 0 : index
    %32 = vector.load %arg3[%31, %c0_6] : memref<128x128xf32, #tpu.memory_space<vmem>>, vector<1x128xf32>
    %33 = arith.index_cast %27 : i32 to index
    %c0_7 = arith.constant 0 : index
    %34 = vector.load %arg4[%33, %c0_7] : memref<16x128xf32, #tpu.memory_space<vmem>>, vector<1x128xf32>
    tpu.vector_store %arg4[%33, %c0_7], %32 {strides = array<i32>} : memref<16x128xf32, #tpu.memory_space<vmem>>, vector<1x128xf32>,
    %c4_i32 = arith.constant 4 : i32
    %35 = arith.addi %2, %c4_i32 : i32
    %36 = arith.addi %0, %35 : i32
    %37 = arith.index_cast %36 : i32 to index
    %38 = memref.load %arg1[%37] : memref<16xi32, #tpu.memory_space<smem>>
    %39 = arith.index_cast %38 : i32 to index
    %c0_8 = arith.constant 0 : index
    %40 = vector.load %arg3[%39, %c0_8] : memref<128x128xf32, #tpu.memory_space<vmem>>, vector<1x128xf32>
    %41 = arith.index_cast %35 : i32 to index
    %c0_9 = arith.constant 0 : index
    %42 = vector.load %arg4[%41, %c0_9] : memref<16x128xf32, #tpu.memory_space<vmem>>, vector<1x128xf32>
    tpu.vector_store %arg4[%41, %c0_9], %40 {strides = array<i32>} : memref<16x128xf32, #tpu.memory_space<vmem>>, vector<1x128xf32>,
    %c5_i32 = arith.constant 5 : i32
    %43 = arith.addi %2, %c5_i32 : i32
    %44 = arith.addi %0, %43 : i32
    %45 = arith.index_cast %44 : i32 to index
    %46 = memref.load %arg1[%45] : memref<16xi32, #tpu.memory_space<smem>>
    %47 = arith.index_cast %46 : i32 to index
    %c0_10 = arith.constant 0 : index
    %48 = vector.load %arg3[%47, %c0_10] : memref<128x128xf32, #tpu.memory_space<vmem>>, vector<1x128xf32>
    %49 = arith.index_cast %43 : i32 to index
    %c0_11 = arith.constant 0 : index
    %50 = vector.load %arg4[%49, %c0_11] : memref<16x128xf32, #tpu.memory_space<vmem>>, vector<1x128xf32>
    tpu.vector_store %arg4[%49, %c0_11], %48 {strides = array<i32>} : memref<16x128xf32, #tpu.memory_space<vmem>>, vector<1x128xf32>,
    %c6_i32 = arith.constant 6 : i32
    %51 = arith.addi %2, %c6_i32 : i32
    %52 = arith.addi %0, %51 : i32
    %53 = arith.index_cast %52 : i32 to index
    %54 = memref.load %arg1[%53] : memref<16xi32, #tpu.memory_space<smem>>
    %55 = arith.index_cast %54 : i32 to index
    %c0_12 = arith.constant 0 : index
    %56 = vector.load %arg3[%55, %c0_12] : memref<128x128xf32, #tpu.memory_space<vmem>>, vector<1x128xf32>
    %57 = arith.index_cast %51 : i32 to index
    %c0_13 = arith.constant 0 : index
    %58 = vector.load %arg4[%57, %c0_13] : memref<16x128xf32, #tpu.memory_space<vmem>>, vector<1x128xf32>
    tpu.vector_store %arg4[%57, %c0_13], %56 {strides = array<i32>} : memref<16x128xf32, #tpu.memory_space<vmem>>, vector<1x128xf32>,
    %c7_i32 = arith.constant 7 : i32
    %59 = arith.addi %2, %c7_i32 : i32
    %60 = arith.addi %0, %59 : i32
    %61 = arith.index_cast %60 : i32 to index
    %62 = memref.load %arg1[%61] : memref<16xi32, #tpu.memory_space<smem>>
    %63 = arith.index_cast %62 : i32 to index
    %c0_14 = arith.constant 0 : index
    %64 = vector.load %arg3[%63, %c0_14] : memref<128x128xf32, #tpu.memory_space<vmem>>, vector<1x128xf32>
    %65 = arith.index_cast %59 : i32 to index
    %c0_15 = arith.constant 0 : index
    %66 = vector.load %arg4[%65, %c0_15] : memref<16x128xf32, #tpu.memory_space<vmem>>, vector<1x128xf32>
    tpu.vector_store %arg4[%65, %c0_15], %64 {strides = array<i32>} : memref<16x128xf32, #tpu.memory_space<vmem>>, vector<1x128xf32>,
    %c1_i32_16 = arith.constant 1 : i32
    %c8_i32_17 = arith.constant 8 : i32
    %67 = arith.muli %c1_i32_16, %c8_i32_17 : i32
    %68 = tpu.assume_multiple %67, 8 : i32
    %c0_i32_18 = arith.constant 0 : i32
    %69 = arith.addi %68, %c0_i32_18 : i32
    %70 = arith.addi %0, %69 : i32
    %71 = arith.index_cast %70 : i32 to index
    %72 = memref.load %arg1[%71] : memref<16xi32, #tpu.memory_space<smem>>
    %73 = arith.index_cast %72 : i32 to index
    %c0_19 = arith.constant 0 : index
    %74 = vector.load %arg3[%73, %c0_19] : memref<128x128xf32, #tpu.memory_space<vmem>>, vector<1x128xf32>
    %75 = arith.index_cast %69 : i32 to index
    %c0_20 = arith.constant 0 : index
    %76 = vector.load %arg4[%75, %c0_20] : memref<16x128xf32, #tpu.memory_space<vmem>>, vector<1x128xf32>
    tpu.vector_store %arg4[%75, %c0_20], %74 {strides = array<i32>} : memref<16x128xf32, #tpu.memory_space<vmem>>, vector<1x128xf32>,
    %c1_i32_21 = arith.constant 1 : i32
    %77 = arith.addi %68, %c1_i32_21 : i32
    %78 = arith.addi %0, %77 : i32
    %79 = arith.index_cast %78 : i32 to index
    %80 = memref.load %arg1[%79] : memref<16xi32, #tpu.memory_space<smem>>
    %81 = arith.index_cast %80 : i32 to index
    %c0_22 = arith.constant 0 : index
    %82 = vector.load %arg3[%81, %c0_22] : memref<128x128xf32, #tpu.memory_space<vmem>>, vector<1x128xf32>
    %83 = arith.index_cast %77 : i32 to index
    %c0_23 = arith.constant 0 : index
    %84 = vector.load %arg4[%83, %c0_23] : memref<16x128xf32, #tpu.memory_space<vmem>>, vector<1x128xf32>
    tpu.vector_store %arg4[%83, %c0_23], %82 {strides = array<i32>} : memref<16x128xf32, #tpu.memory_space<vmem>>, vector<1x128xf32>,
    %c2_i32_24 = arith.constant 2 : i32
    %85 = arith.addi %68, %c2_i32_24 : i32
    %86 = arith.addi %0, %85 : i32
    %87 = arith.index_cast %86 : i32 to index
    %88 = memref.load %arg1[%87] : memref<16xi32, #tpu.memory_space<smem>>
    %89 = arith.index_cast %88 : i32 to index
    %c0_25 = arith.constant 0 : index
    %90 = vector.load %arg3[%89, %c0_25] : memref<128x128xf32, #tpu.memory_space<vmem>>, vector<1x128xf32>
    %91 = arith.index_cast %85 : i32 to index
    %c0_26 = arith.constant 0 : index
    %92 = vector.load %arg4[%91, %c0_26] : memref<16x128xf32, #tpu.memory_space<vmem>>, vector<1x128xf32>
    tpu.vector_store %arg4[%91, %c0_26], %90 {strides = array<i32>} : memref<16x128xf32, #tpu.memory_space<vmem>>, vector<1x128xf32>,
    %c3_i32_27 = arith.constant 3 : i32
    %93 = arith.addi %68, %c3_i32_27 : i32
    %94 = arith.addi %0, %93 : i32
    %95 = arith.index_cast %94 : i32 to index
    %96 = memref.load %arg1[%95] : memref<16xi32, #tpu.memory_space<smem>>
    %97 = arith.index_cast %96 : i32 to index
    %c0_28 = arith.constant 0 : index
    %98 = vector.load %arg3[%97, %c0_28] : memref<128x128xf32, #tpu.memory_space<vmem>>, vector<1x128xf32>
    %99 = arith.index_cast %93 : i32 to index
    %c0_29 = arith.constant 0 : index
    %100 = vector.load %arg4[%99, %c0_29] : memref<16x128xf32, #tpu.memory_space<vmem>>, vector<1x128xf32>
    tpu.vector_store %arg4[%99, %c0_29], %98 {strides = array<i32>} : memref<16x128xf32, #tpu.memory_space<vmem>>, vector<1x128xf32>,
    %c4_i32_30 = arith.constant 4 : i32
    %101 = arith.addi %68, %c4_i32_30 : i32
    %102 = arith.addi %0, %101 : i32
    %103 = arith.index_cast %102 : i32 to index
    %104 = memref.load %arg1[%103] : memref<16xi32, #tpu.memory_space<smem>>
    %105 = arith.index_cast %104 : i32 to index
    %c0_31 = arith.constant 0 : index
    %106 = vector.load %arg3[%105, %c0_31] : memref<128x128xf32, #tpu.memory_space<vmem>>, vector<1x128xf32>
    %107 = arith.index_cast %101 : i32 to index
    %c0_32 = arith.constant 0 : index
    %108 = vector.load %arg4[%107, %c0_32] : memref<16x128xf32, #tpu.memory_space<vmem>>, vector<1x128xf32>
    tpu.vector_store %arg4[%107, %c0_32], %106 {strides = array<i32>} : memref<16x128xf32, #tpu.memory_space<vmem>>, vector<1x128xf32>,
    %c5_i32_33 = arith.constant 5 : i32
    %109 = arith.addi %68, %c5_i32_33 : i32
    %110 = arith.addi %0, %109 : i32
    %111 = arith.index_cast %110 : i32 to index
    %112 = memref.load %arg1[%111] : memref<16xi32, #tpu.memory_space<smem>>
    %113 = arith.index_cast %112 : i32 to index
    %c0_34 = arith.constant 0 : index
    %114 = vector.load %arg3[%113, %c0_34] : memref<128x128xf32, #tpu.memory_space<vmem>>, vector<1x128xf32>
    %115 = arith.index_cast %109 : i32 to index
    %c0_35 = arith.constant 0 : index
    %116 = vector.load %arg4[%115, %c0_35] : memref<16x128xf32, #tpu.memory_space<vmem>>, vector<1x128xf32>
    tpu.vector_store %arg4[%115, %c0_35], %114 {strides = array<i32>} : memref<16x128xf32, #tpu.memory_space<vmem>>, vector<1x128xf32>,
    %c6_i32_36 = arith.constant 6 : i32
    %117 = arith.addi %68, %c6_i32_36 : i32
    %118 = arith.addi %0, %117 : i32
    %119 = arith.index_cast %118 : i32 to index
    %120 = memref.load %arg1[%119] : memref<16xi32, #tpu.memory_space<smem>>
    %121 = arith.index_cast %120 : i32 to index
    %c0_37 = arith.constant 0 : index
    %122 = vector.load %arg3[%121, %c0_37] : memref<128x128xf32, #tpu.memory_space<vmem>>, vector<1x128xf32>
    %123 = arith.index_cast %117 : i32 to index
    %c0_38 = arith.constant 0 : index
    %124 = vector.load %arg4[%123, %c0_38] : memref<16x128xf32, #tpu.memory_space<vmem>>, vector<1x128xf32>
    tpu.vector_store %arg4[%123, %c0_38], %122 {strides = array<i32>} : memref<16x128xf32, #tpu.memory_space<vmem>>, vector<1x128xf32>,
    %c7_i32_39 = arith.constant 7 : i32
    %125 = arith.addi %68, %c7_i32_39 : i32
    %126 = arith.addi %0, %125 : i32
    %127 = arith.index_cast %126 : i32 to index
    %128 = memref.load %arg1[%127] : memref<16xi32, #tpu.memory_space<smem>>
    %129 = arith.index_cast %128 : i32 to index
    %c0_40 = arith.constant 0 : index
    %130 = vector.load %arg3[%129, %c0_40] : memref<128x128xf32, #tpu.memory_space<vmem>>, vector<1x128xf32>
    %131 = arith.index_cast %125 : i32 to index
    %c0_41 = arith.constant 0 : index
    %132 = vector.load %arg4[%131, %c0_41] : memref<16x128xf32, #tpu.memory_space<vmem>>, vector<1x128xf32>
    tpu.vector_store %arg4[%131, %c0_41], %130 {strides = array<i32>} : memref<16x128xf32, #tpu.memory_space<vmem>>, vector<1x128xf32>,
    %c2_i32_42 = arith.constant 2 : i32
    %c0_43 = arith.constant 0 : index
    %c0_44 = arith.constant 0 : index
    %133 = vector.load %arg4[%c0_43, %c0_44] : memref<16x128xf32, #tpu.memory_space<vmem>>, vector<16x128xf32>
    %cst = arith.constant dense<0xFF800000> : vector<16xf32>
    %134 = vector.multi_reduction <maximumf>, %133, %cst [1] : vector<16x128xf32> to vector<16xf32>
    %135 = vector.shape_cast %134 : vector<16xf32> to vector<16x1xf32>
    %136 = vector.broadcast %135 : vector<16x1xf32> to vector<16x128xf32>
    %137 = arith.subf %133, %136 : vector<16x128xf32>
    %138 = math.exp %137 : vector<16x128xf32>
    %cst_45 = arith.constant dense<0.000000e+00> : vector<16xf32>
    %139 = vector.multi_reduction <add>, %138, %cst_45 [1] : vector<16x128xf32> to vector<16xf32>
    %140 = vector.shape_cast %139 : vector<16xf32> to vector<16x1xf32>
    %141 = math.log %140 : vector<16x1xf32>
    %142 = arith.addf %135, %141 : vector<16x1xf32>
    %143 = tpu.iota {dimensions = array<i32: 1>} : vector<16x128xi32>
    %c0_46 = arith.constant 0 : index
    %c0_47 = arith.constant 0 : index
    %144 = vector.load %arg2[%c0_46, %c0_47] : memref<16x1xi32, #tpu.memory_space<vmem>>, vector<16x1xi32>
    %145 = vector.broadcast %144 : vector<16x1xi32> to vector<16x128xi32>
    %146 = arith.cmpi eq, %143, %145 : vector<16x128xi32>
    %cst_48 = arith.constant 0.000000e+00 : f32
    %147 = vector.broadcast %cst_48 : f32 to vector<16x128xf32>
    %148 = arith.select %146, %133, %147 : vector<16x128xi1>, vector<16x128xf32>
    %cst_49 = arith.constant dense<0.000000e+00> : vector<16xf32>
    %149 = vector.multi_reduction <add>, %148, %cst_49 [1] : vector<16x128xf32> to vector<16xf32>
    %150 = vector.shape_cast %149 : vector<16xf32> to vector<16x1xf32>
    %151 = tpu.iota {dimensions = array<i32: 0>} : vector<16x1xi32>
    %152 = vector.broadcast %0 : i32 to vector<16x1xi32>
    %153 = arith.addi %152, %151 : vector<16x1xi32>
    %c16_i32_50 = arith.constant 16 : i32
    %154 = vector.broadcast %c16_i32_50 : i32 to vector<16x1xi32>
    %155 = arith.cmpi slt, %153, %154 : vector<16x1xi32>
    %156 = arith.subf %142, %150 : vector<16x1xf32>
    %cst_51 = arith.constant 0.000000e+00 : f32
    %157 = vector.broadcast %cst_51 : f32 to vector<16x1xf32>
    %158 = arith.select %155, %156, %157 : vector<16x1xi1>, vector<16x1xf32>
    %c0_52 = arith.constant 0 : index
    %c0_53 = arith.constant 0 : index
    %159 = vector.load %arg5[%c0_52, %c0_53] : memref<16x1xf32, #tpu.memory_space<vmem>>, vector<16x1xf32>
    tpu.vector_store %arg5[%c0_52, %c0_53], %158 {strides = array<i32>} : memref<16x1xf32, #tpu.memory_space<vmem>>, vector<16x1xf32>,
    return
  }
  func.func @transform_0(%arg0: i32, %arg1: memref<16xi32, #tpu.memory_space<smem>>) -> (i32, i32) {
    %c0_i32 = arith.constant 0 : i32
    %c0_i32_0 = arith.constant 0 : i32
    return %arg0, %c0_i32 : i32, i32
  }
  func.func @transform_1(%arg0: i32, %arg1: memref<16xi32, #tpu.memory_space<smem>>) -> (i32, i32) {
    %c0_i32 = arith.constant 0 : i32
    %c0_i32_0 = arith.constant 0 : i32
    %c0_i32_1 = arith.constant 0 : i32
    return %c0_i32, %c0_i32_0 : i32, i32
  }
  func.func @transform_2(%arg0: i32, %arg1: memref<16xi32, #tpu.memory_space<smem>>) -> (i32, i32) {
    %c0_i32 = arith.constant 0 : i32
    %c0_i32_0 = arith.constant 0 : i32
    return %arg0, %c0_i32 : i32, i32
  }
  func.func @transform_3(%arg0: i32, %arg1: memref<16xi32, #tpu.memory_space<smem>>) -> (i32, i32) {
    %c0_i32 = arith.constant 0 : i32
    %c0_i32_0 = arith.constant 0 : i32
    return %arg0, %c0_i32 : i32, i32
  }
}

</mosaic_0001>

<bundles_post_ra>
// kernel: _bigram_pallas.1
= control target key start
LH: loop header
LB: loop body
LE: loop exit
PB: predicated region body
PF: predicated region fallthrough
CT: control target
= control target key end

     0   :  { %s435_s0 = inlined_call_operand.vmem [shape: s32[16], index: 0, kind: input, shape index: {}]   ;;  %s436_s1 = inlined_call_operand.vmem [shape: s32[16,1], index: 1, kind: input, shape index: {}]   ;;  %s437_s2 = inlined_call_operand.hbm [shape: f32[128,128], index: 2, kind: input, shape index: {}]   ;;  %s438_s3 = inlined_call_operand.hbm [shape: f32[16,128], index: 3, kind: output, shape index: {0}]   ;;  %s439_s4 = inlined_call_operand.vmem [shape: f32[16,1], index: 4, kind: output, shape index: {1}]  }
   0x1   :  { %s10_s17 = sshll.u32 %s435_s0, 4  ;;  %s11_s17 = int_to_ptr.vmem [resolvable:$true] %s10_s17 }
   0x2   :  { %s282_s18 = scalar_lea.vmem %s11_s17, 16  ;;  %p287_p1 = scmp.lt.s32.totalorder %s11_s17, %s11_s17 }
   0x3   :  { %p283_p0 = scmp.ne.s32.totalorder %s11_s17, %s282_s18  ;;  %p288_p2 = scmp.lt.s32.totalorder %s282_s18, %s282_s18 }
   0x5   :  { %p289_p3 = por %p288_p2, %p287_p1 }
   0x7   :  { %p290_p4 = pnand %p289_p3, %p283_p0 }
   0x9   :  { %293 = shalt.err (!%p290_p4)  }
   0xa   :  { %s344_s19 = smov [#allocation3]  }
   0xb   :  { %13 = dma.vmem_to_smem %s11_s17, 16, %s344_s19, [#allocation2] }
   0xc   :  { %338 = dma.done.wait [#allocation2], 16 }
   0xd   :  { %339 = vsyncadd [#allocation2], 4294967280 }
   0xe   :  { %15 = sfence }
   0xf   :  { %16 = vsyncpa [#allocation5], 0 }
  0x10   :  { %17 = vsyncpa [#allocation6], 0  ;;  %s345_s20 = smov [#allocation4]   ;;  %s294_s23 = scalar_lea.hbm %s437_s2, 2048 }
  0x11   :  { %s25_s21 = sshll.u32 %s345_s20, 4  ;;  %p295_p5 = scmp.ne.s32.totalorder %s437_s2, %s294_s23  ;;  %s26_s21 = int_to_ptr.vmem [resolvable:$true] %s25_s21 }
  0x12   :  { %p298_p6 = scmp.lt.u32.totalorder %s294_s23, %s437_s2 }
  0x14   :  { %p300_p7 = pnand %p298_p6, %p295_p5 }
  0x16   :  { %303 = shalt.err (!%p300_p7)
}
  0x17   :  { %s304_s28 = scalar_lea.vmem %s26_s21, 2048  ;;  %p309_p9 = scmp.lt.s32.totalorder %s26_s21, %s26_s21 }
  0x18   :  { %p305_p8 = scmp.ne.s32.totalorder %s26_s21, %s304_s28  ;;  %p310_p10 = scmp.lt.s32.totalorder %s304_s28, %s304_s28 }
  0x1a   :  { %p311_p11 = por %p310_p10, %p309_p9 }
  0x1c   :  { %p312_p12 = pnand %p311_p11, %p305_p8 }
  0x1e   :  { %315 = shalt.err (!%p312_p12)
}
  0x1f   :  { %s346_s29 = smov 128   ;;  %s347_s30 = smov 8  }
  0x20   :  { %31 = dma.hbm_to_vmem [thread:$0]  %s437_s2, 2048, %s26_s21, [#allocation5], %s346_s29, %s346_s29, %s347_s30  }
  0x21   :  { %340 = dma.done.wait [#allocation5], 2048  }
  0x22   :  { %341 = vsyncadd [#allocation5], 4294965248  ;;  %s37_s7 = sld [smem:[#allocation3]]  ;;  %s251_s8 = sld [smem:[#allocation3 + $0x1]]  ;;  %v348_v0 = vmov 0   ;;  %v169_v1 = vld [vmem:[%s436_s1] sm:$0xff]  ;;  %v167_v24 = vlaneseq }
  0x23   :  { %272 = vset.pattern.permute.xlu1 %v348_v0  ;;  %273 = vset.pattern.permute.xlu0 %v348_v0  ;;  %s252_s9 = sld [smem:[#allocation3 + $0x2]]  ;;  %s253_s10 = sld [smem:[#allocation3 + $0x3]]  ;;  %v170_v2 = vld [vmem:[%s436_s1 + $0x8] sm:$0xff] }
  0x24   :  { %s254_s11 = sld [smem:[#allocation3 + $0x4]]  ;;  %s255_s12 = sld [smem:[#allocation3 + $0x5]]  ;;  %172 = vperm.xlu1 %272, %v169_v1   ;;  %v168_v26 = vand.u32 127, %v167_v24 }
  0x25   :  { %s256_s13 = sld [smem:[#allocation3 + $0x6]]  ;;  %s393_s14 = sld [smem:[#allocation3 + $0x7]] }
  0x26   :  { %s395_s15 = sld [smem:[#allocation3 + $0x8]]  ;;  %s397_s16 = sld [smem:[#allocation3 + $0x9]] }
  0x27   :  { %s399_s17 = sld [smem:[#allocation3 + $0xa]]  ;;  %s401_s2 = sld [smem:[#allocation3 + $0xb]] }
  0x28   :  { %s38_s22 = scalar_lea.vmem [#allocation4], %s37_s7  ;;  %s44_s0 = scalar_lea.vmem [#allocation4], %s251_s8  ;;  %175 = vperm.xlu1 %272, %v170_v2  }
  0x29   :  { %v39_v3 = vld [vmem:[%s38_s22] sm:$0x1]  ;;  %s51_s23 = scalar_lea.vmem [#allocation4], %s252_s9  ;;  %s58_s24 = scalar_lea.vmem [#allocation4], %s253_s10 }
  0x2a   :  { %v45_v4 = vld [vmem:[%s44_s0] sm:$0x1]  ;;  %40 = vst [vmem:[#allocation7] sm:$0x1] %v39_v3  ;;  %s65_s25 = scalar_lea.vmem [#allocation4], %s254_s11  ;;  %s72_s26 = scalar_lea.vmem [#allocation4], %s255_s12 }
  0x2b   :  { %47 = vst [vmem:[#allocation7 + $0x1] sm:$0x1] %v45_v4  ;;  %v52_v5 = vld [vmem:[%s51_s23] sm:$0x1]  ;;  %s79_s1 = scalar_lea.vmem [#allocation4], %s256_s13  ;;  %s86_s27 = scalar_lea.vmem [#allocation4], %s393_s14 }
  0x2c   :  { %v59_v6 = vld [vmem:[%s58_s24] sm:$0x1]  ;;  %54 = vst [vmem:[#allocation7 + $0x2] sm:$0x1] %v52_v5  ;;  %s92_s28 = scalar_lea.vmem [#allocation4], %s395_s15  ;;  %s99_s5 = scalar_lea.vmem [#allocation4], %s397_s16 }
  0x2d   :  { %61 = vst [vmem:[#allocation7 + $0x3] sm:$0x1] %v59_v6  ;;  %v66_v7 = vld [vmem:[%s65_s25] sm:$0x1]  ;;  %s106_s6 = scalar_lea.vmem [#allocation4], %s399_s17  ;;  %s113_s7 = scalar_lea.vmem [#allocation4], %s401_s2 }
  0x2e   :  { %v73_v8 = vld [vmem:[%s72_s26] sm:$0x1]  ;;  %68 = vst [vmem:[#allocation7 + $0x4] sm:$0x1] %v66_v7  ;;  %s262_s8 = sld [smem:[#allocation3 + $0xc]]  ;;  %s263_s9 = sld [smem:[#allocation3 + $0xd]] }
  0x2f   :  { %75 = vst [vmem:[#allocation7 + $0x5] sm:$0x1] %v73_v8  ;;  %v80_v9 = vld [vmem:[%s79_s1] sm:$0x1]  ;;  %s264_s10 = sld [smem:[#allocation3 + $0xe]]  ;;  %s265_s11 = sld [smem:[#allocation3 + $0xf]] }
  0x30   :  { %v87_v10 = vld [vmem:[%s86_s27] sm:$0x1]  ;;  %82 = vst [vmem:[#allocation7 + $0x6] sm:$0x1] %v80_v9  ;;  %s349_s16 = smov [#allocation7]  }
  0x31   :  { %89 = vst [vmem:[#allocation7 + $0x7] sm:$0x1] %v87_v10  ;;  %v93_v11 = vld [vmem:[%s92_s28] sm:$0x1]  ;;  %s205_s17 = sshll.u32 %s349_s16, 4  ;;  %s206_s17 = int_to_ptr.vmem [resolvable:$true] %s205_s17 }
  0x32   :  { %v100_v12 = vld [vmem:[%s99_s5] sm:$0x1]  ;;  %95 = vst [vmem:[#allocation7 + $0x8] sm:$0x1] %v93_v11  ;;  %s316_s2 = scalar_lea.vmem %s206_s17, 256  ;;  %p321_p0 = scmp.lt.s32.totalorder %s206_s17, %s206_s17 }
  0x33   :  { %102 = vst [vmem:[#allocation7 + $0x9] sm:$0x1] %v100_v12  ;;  %v107_v13 = vld [vmem:[%s106_s6] sm:$0x1]  ;;  %p317_p13 = scmp.ne.s32.totalorder %s206_s17, %s316_s2  ;;  %p322_p1 = scmp.lt.s32.totalorder %s316_s2, %s316_s2 }
  0x34   :  { %v114_v14 = vld [vmem:[%s113_s7] sm:$0x1]  ;;  %109 = vst [vmem:[#allocation7 + $0xa] sm:$0x1] %v107_v13  ;;  %s120_s12 = scalar_lea.vmem [#allocation4], %s262_s8  ;;  %s127_s13 = scalar_lea.vmem [#allocation4], %s263_s9 }
  0x35   :  { %116 = vst [vmem:[#allocation7 + $0xb] sm:$0x1] %v114_v14  ;;  %v121_v16 = vld [vmem:[%s120_s12] sm:$0x1]  ;;  %s134_s14 = scalar_lea.vmem [#allocation4], %s264_s10  ;;  %s141_s15 = scalar_lea.vmem [#allocation4], %s265_s11 }
  0x36   :  { %123 = vst [vmem:[#allocation7 + $0xc] sm:$0x1] %v121_v16  ;;  %v128_v17 = vld [vmem:[%s127_s13] sm:$0x1]  ;;  %p323_p2 = por %p322_p1, %p321_p0 }
  0x37   :  { %v135_v18 = vld [vmem:[%s134_s14] sm:$0x1]  ;;  %130 = vst [vmem:[#allocation7 + $0xd] sm:$0x1] %v128_v17 }
  0x38   :  { %v145_v15 = vld [vmem:[#allocation7] sm:$0xff]  ;;  %137 = vst [vmem:[#allocation7 + $0xe] sm:$0x1] %v135_v18  ;;  %p324_p3 = pnand %p323_p2, %p317_p13 }
  0x39   :  { %147 = vmax.xlane.f32.xlu0 %v145_v15  ;;  %v142_v19 = vld [vmem:[%s141_s15] sm:$0x1] }
  0x3a   :  { %144 = vst [vmem:[#allocation7 + $0xf] sm:$0x1] %v142_v19 }
  0x41   :  { %v146_v20 = vld [vmem:[#allocation7 + $0x8] sm:$0xff] }
  0x42   :  { %149 = vmax.xlane.f32.xlu0 %v146_v20 }
  0xa3   :  { %v173_v25 = vpop.permute.xlu1 %172 }
  0xa4   :  { %vm177_vm0 = vcmp.eq.s32.totalorder %v168_v26, %v173_v25 }
  0xa5   :  { %v179_v32 = vsel %vm177_vm0, %v145_v15, 0.0 }
  0xa7   :  { %v176_v31 = vpop.permute.xlu1 %175 }
  0xa8   :  { %vm178_vm1 = vcmp.eq.s32.totalorder %v168_v26, %v176_v31 }
  0xa9   :  { %v180_v33 = vsel %vm178_vm1, %v146_v20, 0.0 }
  0xc6   :  { %v148_v21 = vpop.xlane.xlu0 %147 }
  0xc7   :  { %v151_v22 = vsub.f32 %v145_v15, %v148_v21 }
  0xc9   :  { %v153_v23 = vmul.f32 1.442695, %v151_v22 }
  0xcb   :  { %274 = vpow2.f32 %v153_v23 }
  0xcf   :  { %v150_v27 = vpop.xlane.xlu0 %149 }
  0xd0   :  { %v152_v28 = vsub.f32 %v146_v20, %v150_v27 }
  0xd2   :  { %v155_v29 = vmul.f32 1.442695, %v152_v28 }
  0xd4   :  { %276 = vpow2.f32 %v155_v29 }
  0xd5   :  { %v275_v30 = vpop.eup %274 }
  0xd6   :  { %157 = vadd.xlane.f32.xlu0 %v275_v30 }
  0xda   :  { %181 = vadd.xlane.f32.xlu0 %v179_v32 }
  0xde   :  { %183 = vadd.xlane.f32.xlu0 %v180_v33  ;;  %v277_v34 = vpop.eup %276 }
  0xdf   :  { %159 = vadd.xlane.f32.xlu1 %v277_v34 }
  0xe0   :  { %327 = shalt.err (!%p324_p3)
}
  0xe1   :  { %s328_s20 = scalar_lea.hbm %s438_s3, 256 }
  0xe2   :  { %p329_p4 = scmp.ne.s32.totalorder %s438_s3, %s328_s20  ;;  %p332_p5 = scmp.lt.u32.totalorder %s328_s20, %s438_s3 }
  0xe4   :  { %p334_p6 = pnand %p332_p5, %p329_p4 }
  0xe6   :  { %337 = shalt.err (!%p334_p6)
}
  0xe7   :  { %211 = dma.vmem_to_hbm [thread:$0]  %s206_s17, 256, %s438_s3, [#allocation6], %s346_s29, %s346_s29, %s347_s30   ;;  %vm197_vm2 = vcmask 7168  }
 0x163   :  { %v158_v35 = vpop.xlane.xlu0 %157 }
 0x164   :  { %278 = vlog2.f32 %v158_v35 }
 0x167   :  { %v182_v40 = vpop.xlane.xlu0 %181 }
 0x16b   :  { %v184_v45 = vpop.xlane.xlu0 %183 }
 0x16c   :  { %v160_v37 = vpop.xlane.xlu1 %159 }
 0x16d   :  { %280 = vlog2.f32 %v160_v37 }
 0x16e   :  { %v279_v36 = vpop.eup %278 }
 0x16f   :  { %v162_v38 = vmul.f32 0.6931472, %v279_v36 }
 0x171   :  { %v165_v39 = vadd.f32 %v162_v38, %v148_v21 }
 0x173   :  { %v193_v41 = vsub.f32 %v165_v39, %v182_v40 }
 0x175   :  { %198 = vst.msk [vmem:[%s439_s4] sm:$0xff] %vm197_vm2, %v193_v41 }
 0x177   :  { %v281_v42 = vpop.eup %280 }
 0x178   :  { %v164_v43 = vmul.f32 0.6931472, %v281_v42 }
 0x17a   :  { %v166_v44 = vadd.f32 %v164_v43, %v150_v27 }
 0x17c   :  { %v194_v46 = vsub.f32 %v166_v44, %v184_v45 }
 0x17e   :  { %199 = vst.msk [vmem:[%s439_s4 + $0x8] sm:$0xff] %vm197_vm2, %v194_v46 }
 0x17f   :  { %342 = dma.done.wait [#allocation6], 256  }
 0x180   :  { %343 = vsyncadd [#allocation6], 4294967040 }
 0x181   :  { %219 = vsyncpa [#allocation5], 1 }
 0x182   :  { %220 = vsyncpa [#allocation6], 1 }

</bundles_post_ra>
